<compile_context>
chip_gen: v6e
topology: v6e:2x2x1
jax: 0.10.0
libtpu: 0.0.40
codegen_flags: <defaults>
</compile_context>

<pallas_src>
import functools

import jax
import jax.numpy as jnp
from jax.experimental import pallas as pl
from jax.experimental.pallas import tpu as pltpu

LN_EPS = 1e-5  # nn.LayerNorm default


def prenorm_kernel(x_ref, g_ref, b_ref, w_ref, wb_ref, o_ref, y_ref):
    # x_ref : (tm, D)   tile of tokens (full D row: LN needs the whole row)
    # g_ref : (1, D)    LayerNorm gamma
    # b_ref : (1, D)    LayerNorm beta
    # w_ref : (D, tn)   fn (Linear) weight tile, stored (in, out)
    # wb_ref: (1, tn)   fn (Linear) bias tile
    # o_ref : (tm, tn)
    # y_ref : (tm, D)   VMEM scratch in the *weight dtype*: normalized
    #                   activations, computed once per row tile (j == 0) and
    #                   reused for every D_out column tile (j is "arbitrary").
    @pl.when(pl.program_id(1) == 0)
    def _():
        x = x_ref[...].astype(jnp.float32)
        # Two-pass LayerNorm stats (matches nn.LayerNorm; avoids the
        # E[x^2] - mean^2 cancellation issue flagged in review).  f32 VPU math.
        mean = jnp.mean(x, axis=-1, keepdims=True)
        xc = x - mean
        var = jnp.mean(xc * xc, axis=-1, keepdims=True)
        inv_std = jax.lax.rsqrt(var + LN_EPS)
        g = g_ref[...].astype(jnp.float32)
        b = b_ref[...].astype(jnp.float32)
        y = xc * inv_std * g + b
        # Single downcast to the weight dtype -> bf16 weights hit the native
        # bf16 MXU path; done once per row tile instead of once per j step.
        y_ref[...] = y.astype(y_ref.dtype)

    # fn: Linear(D -> tn) on the MXU with f32 accumulation.
    out = jnp.dot(y_ref[...], w_ref[...], preferred_element_type=jnp.float32)
    out = out + wb_ref[...].astype(jnp.float32)
    o_ref[...] = out.astype(o_ref.dtype)


def _round_up(x, m):
    return ((x + m - 1) // m) * m


def _vmem_limit_bytes():
    """Per-generation VMEM budget: ~3/4 of physical VMEM.

    v5e/v6e (128 MiB physical) -> 96 MiB, v7x (64 MiB physical) -> 48 MiB.
    Conservative 48 MiB fallback if the trace-time query is unavailable.
    """
    try:
        cap = pltpu.get_tpu_info().vmem_capacity_bytes
    except Exception:
        cap = 64 * 1024 * 1024
    return max(32 * 1024 * 1024, min(int(cap) * 3 // 4, 112 * 1024 * 1024))


def _pick_row_tile(row_tile, M, D, x_isz, w_isz, vmem_limit):
    """MXU-sized row tile, capped so the activation-side VMEM footprint fits."""
    tm = min(row_tile, _round_up(M, 8))

    def act_bytes(t):
        # 2x double-buffered x tile + y scratch (weight dtype)
        # + ~3 f32-sized in-kernel LN temporaries per element.
        return t * D * (2 * x_isz + w_isz + 3 * 4)

    budget = int(vmem_limit * 0.45)
    while tm > 8 and act_bytes(tm) > budget:
        tm = max(8, _round_up(tm // 2, 8))

    # v7x megacore: guarantee >= 2 row tiles on the "parallel" axis whenever M
    # allows, so both TensorCores get work (costs one extra ~0.35us grid step
    # on single-core chips -- negligible).
    if _round_up(M, tm) // tm == 1 and tm > 8:
        tm = min(tm, _round_up((tm + 1) // 2, 8))
    return tm


def _pick_col_tile(D, D_out_pad, tm, w_isz, out_isz, budget):
    """Lane-dense column tile; prefer full-W residency when it fits VMEM."""

    def col_bytes(tn):
        # double-buffered W tile + double-buffered output tile + bias buffers.
        # NOTE(synk): single-buffering the constant-index W/bias/gamma/beta via
        # pipeline_mode=pl.Buffered(1) would reclaim half of this; left at the
        # default double-buffering for portability.
        return 2 * D * tn * w_isz + 2 * tm * tn * out_isz + 4 * tn * 4

    # Full-W residency: constant W/bias index_map -> fetched from HBM exactly
    # once (revisit-skipped across row tiles) instead of (M/tm) times, and the
    # j axis degenerates to size 1 (LN hoist becomes free as well).
    if col_bytes(D_out_pad) <= budget:
        return D_out_pad
    for tn in (1024, 512, 384, 256, 128):
        if D_out_pad % tn == 0 and col_bytes(tn) <= budget:
            return tn
    return 128  # D_out_pad is always a multiple of 128


@functools.partial(jax.jit, static_argnames=("row_tile",))
def prenorm_linear(x, gamma, beta, w, wb, *, row_tile=512):
    """PreNorm forward: fn(LayerNorm(x)) with fn = Linear(D -> D_out).

    x: (B, N, D) channels-last tokens; LayerNorm is over the last axis.
    """
    B, N, D = x.shape
    D_in, D_out = w.shape
    assert D_in == D
    M = B * N
    x2 = x.reshape(M, D)

    x_isz = jnp.dtype(x.dtype).itemsize
    w_isz = jnp.dtype(w.dtype).itemsize
    vmem_limit = _vmem_limit_bytes()

    # --- Row tiling: pad M up to the tile instead of asserting divisibility.
    tm = _pick_row_tile(row_tile, M, D, x_isz, w_isz, vmem_limit)
    M_pad = _round_up(M, tm)
    if M_pad != M:
        # Padded rows give y = beta and a throwaway matmul row; sliced off below.
        x2 = jnp.pad(x2, ((0, M_pad - M), (0, 0)))

    # --- Column tiling: pad D_out to a multiple of 128 so output stores are
    # unmasked lane-dense vst and the W block never has a sub-128 last dim.
    D_out_pad = _round_up(D_out, 128)
    if D_out_pad != D_out:
        w = jnp.pad(w, ((0, 0), (0, D_out_pad - D_out)))
        wb = jnp.pad(wb, ((0, D_out_pad - D_out),))

    act_bytes = tm * D * (2 * x_isz + w_isz + 3 * 4)
    col_budget = max(vmem_limit - act_bytes - 4 * D * 4 - 6 * 1024 * 1024,
                     2 * 1024 * 1024)
    tn = _pick_col_tile(D, D_out_pad, tm, w_isz, x_isz, col_budget)

    g2 = gamma.reshape(1, D)
    b2 = beta.reshape(1, D)
    wb2 = wb.reshape(1, D_out_pad)

    grid = (M_pad // tm, D_out_pad // tn)

    out2 = pl.pallas_call(
        prenorm_kernel,
        out_shape=jax.ShapeDtypeStruct((M_pad, D_out_pad), x.dtype),
        grid_spec=pltpu.PrefetchScalarGridSpec(
            num_scalar_prefetch=0,
            grid=grid,
            in_specs=[
                pl.BlockSpec((tm, D), lambda i, j: (i, 0)),   # x tile (full D)
                pl.BlockSpec((1, D), lambda i, j: (0, 0)),    # gamma
                pl.BlockSpec((1, D), lambda i, j: (0, 0)),    # beta
                pl.BlockSpec((D, tn), lambda i, j: (0, j)),   # linear W tile
                pl.BlockSpec((1, tn), lambda i, j: (0, j)),   # linear bias tile
            ],
            out_specs=pl.BlockSpec((tm, tn), lambda i, j: (i, j)),
            # Cached normalized activations (weight dtype) for the j sweep.
            scratch_shapes=[pltpu.VMEM((tm, D), w.dtype)],
        ),
        compiler_params=pltpu.CompilerParams(
            # i: independent row tiles (megacore split on v7x).
            # j: must be "arbitrary" -- the y scratch carries state across it.
            dimension_semantics=("parallel", "arbitrary"),
            vmem_limit_bytes=vmem_limit,
        ),
    )(x2, g2, b2, w, wb2)

    out2 = out2[:M, :D_out]
    return out2.reshape(B, N, D_out)


def _reference(x, gamma, beta, w, wb):
    xf = x.astype(jnp.float32)
    mean = jnp.mean(xf, axis=-1, keepdims=True)
    var = jnp.mean((xf - mean) ** 2, axis=-1, keepdims=True)
    xn = (xf - mean) / jnp.sqrt(var + LN_EPS)
    y = xn * gamma.astype(jnp.float32) + beta.astype(jnp.float32)
    return (y @ w.astype(jnp.float32) + wb.astype(jnp.float32)).astype(x.dtype)


if __name__ == "__main__":
    key = jax.random.PRNGKey(0)
    k_x, k_w, k_wb, k_x2, k_w2, k_wb2 = jax.random.split(key, 6)

    # --- Check 1: nominal small shapes (D=32; D_out padded to 128 internally).
    B, N, D = 2, 8, 32  # batch, seq, hidden (dim)
    x = jax.random.normal(k_x, (B, N, D), dtype=jnp.float32)
    gamma = jnp.ones((D,), dtype=jnp.float32)   # nn.LayerNorm weight init
    beta = jnp.zeros((D,), dtype=jnp.float32)   # nn.LayerNorm bias init
    w = jax.random.normal(k_w, (D, D), dtype=jnp.float32) * 0.02   # fn: Linear
    wb = jax.random.normal(k_wb, (D,), dtype=jnp.float32) * 0.02

    out = jax.block_until_ready(prenorm_linear(x, gamma, beta, w, wb))
    ref = _reference(x, gamma, beta, w, wb)
    assert out.shape == (B, N, D)
    assert jnp.allclose(out, ref, atol=1e-5, rtol=1e-5)

    # --- Check 2: lane-aligned dims, row padding, full-W residency, 2 row tiles.
    B2, N2, D2, DO2 = 2, 150, 128, 256
    x2 = jax.random.normal(k_x2, (B2, N2, D2), dtype=jnp.float32)
    g2 = 1.0 + 0.1 * jax.random.normal(jax.random.PRNGKey(1), (D2,), jnp.float32)
    b2 = 0.1 * jax.random.normal(jax.random.PRNGKey(2), (D2,), jnp.float32)
    w2 = jax.random.normal(k_w2, (D2, DO2), dtype=jnp.float32) * 0.02
    wb2 = jax.random.normal(k_wb2, (DO2,), dtype=jnp.float32) * 0.02

    out2 = jax.block_until_ready(prenorm_linear(x2, g2, b2, w2, wb2))
    ref2 = _reference(x2, g2, b2, w2, wb2)
    assert out2.shape == (B2, N2, DO2)
    assert jnp.allclose(out2, ref2, atol=1e-4, rtol=1e-4)

    # --- Check 3: bf16 weights -> native bf16 MXU path with f32 accumulation.
    out3 = jax.block_until_ready(
        prenorm_linear(x2, g2, b2, w2.astype(jnp.bfloat16), wb2))
    assert jnp.allclose(out3, ref2, atol=2e-2, rtol=2e-2)

    print("KERNEL_OK")
</pallas_src>

<mosaic_0001>
module attributes {stable_mosaic.version = 11 : i64} {
  func.func @prenorm_kernel(%arg0: i32, %arg1: i32, %arg2: memref<8x32xf32, #tpu.memory_space<vmem>>, %arg3: memref<1x32xf32, #tpu.memory_space<vmem>>, %arg4: memref<1x32xf32, #tpu.memory_space<vmem>>, %arg5: memref<32x128xf32, #tpu.memory_space<vmem>>, %arg6: memref<1x128xf32, #tpu.memory_space<vmem>>, %arg7: memref<8x128xf32, #tpu.memory_space<vmem>>, %arg8: memref<8x32xf32, #tpu.memory_space<vmem>>) attributes {dimension_semantics = [#tpu.dimension_semantics<parallel>, #tpu.dimension_semantics<arbitrary>], iteration_bounds = array<i64: 2, 1>, scalar_prefetch = 0 : i64, scratch_operands = 1 : i64, tpu.core_type = #tpu.core_type<tc>, window_params = [{transform_indices = @transform_0, window_bounds = array<i64: 8, 32>}, {pipeline_mode = #tpu.pipeline_mode<synchronous>, transform_indices = @transform_1, window_bounds = array<i64: 1, 32>}, {pipeline_mode = #tpu.pipeline_mode<synchronous>, transform_indices = @transform_2, window_bounds = array<i64: 1, 32>}, {transform_indices = @transform_3, window_bounds = array<i64: 32, 128>}, {transform_indices = @transform_4, window_bounds = array<i64: 1, 128>}, {transform_indices = @transform_5, window_bounds = array<i64: 8, 128>}]} {
    %c0_i32 = arith.constant 0 : i32
    %0 = arith.cmpi eq, %arg1, %c0_i32 : i32
    %1 = arith.extui %0 : i1 to i32
    %c0_i32_0 = arith.constant 0 : i32
    %2 = arith.cmpi ne, %1, %c0_i32_0 : i32
    scf.if %2 {
      %c0_8 = arith.constant 0 : index
      %c0_9 = arith.constant 0 : index
      %10 = vector.load %arg2[%c0_8, %c0_9] : memref<8x32xf32, #tpu.memory_space<vmem>>, vector<8x32xf32>
      %cst_10 = arith.constant dense<0.000000e+00> : vector<8xf32>
      %11 = vector.multi_reduction <add>, %10, %cst_10 [1] : vector<8x32xf32> to vector<8xf32>
      %12 = vector.shape_cast %11 : vector<8xf32> to vector<8x1xf32>
      %cst_11 = arith.constant 3.200000e+01 : f32
      %13 = vector.broadcast %cst_11 : f32 to vector<8x1xf32>
      %14 = arith.divf %12, %13 : vector<8x1xf32>
      %15 = vector.broadcast %14 : vector<8x1xf32> to vector<8x32xf32>
      %16 = arith.subf %10, %15 : vector<8x32xf32>
      %17 = arith.mulf %16, %16 : vector<8x32xf32>
      %cst_12 = arith.constant dense<0.000000e+00> : vector<8xf32>
      %18 = vector.multi_reduction <add>, %17, %cst_12 [1] : vector<8x32xf32> to vector<8xf32>
      %19 = vector.shape_cast %18 : vector<8xf32> to vector<8x1xf32>
      %cst_13 = arith.constant 3.200000e+01 : f32
      %20 = vector.broadcast %cst_13 : f32 to vector<8x1xf32>
      %21 = arith.divf %19, %20 : vector<8x1xf32>
      %cst_14 = arith.constant 9.99999974E-6 : f32
      %22 = vector.broadcast %cst_14 : f32 to vector<8x1xf32>
      %23 = arith.addf %21, %22 : vector<8x1xf32>
      %24 = math.rsqrt %23 : vector<8x1xf32>
      %c0_15 = arith.constant 0 : index
      %c0_16 = arith.constant 0 : index
      %25 = vector.load %arg3[%c0_15, %c0_16] : memref<1x32xf32, #tpu.memory_space<vmem>>, vector<1x32xf32>
      %c0_17 = arith.constant 0 : index
      %c0_18 = arith.constant 0 : index
      %26 = vector.load %arg4[%c0_17, %c0_18] : memref<1x32xf32, #tpu.memory_space<vmem>>, vector<1x32xf32>
      %27 = vector.broadcast %24 : vector<8x1xf32> to vector<8x32xf32>
      %28 = arith.mulf %16, %27 : vector<8x32xf32>
      %29 = vector.broadcast %25 : vector<1x32xf32> to vector<8x32xf32>
      %30 = arith.mulf %28, %29 : vector<8x32xf32>
      %31 = vector.broadcast %26 : vector<1x32xf32> to vector<8x32xf32>
      %32 = arith.addf %30, %31 : vector<8x32xf32>
      %c0_19 = arith.constant 0 : index
      %c0_20 = arith.constant 0 : index
      %33 = vector.load %arg8[%c0_19, %c0_20] : memref<8x32xf32, #tpu.memory_space<vmem>>, vector<8x32xf32>
      tpu.vector_store %arg8[%c0_19, %c0_20], %32 {strides = array<i32>} : memref<8x32xf32, #tpu.memory_space<vmem>>, vector<8x32xf32>,
    } else {
    }
    %c0 = arith.constant 0 : index
    %c0_1 = arith.constant 0 : index
    %3 = vector.load %arg8[%c0, %c0_1] : memref<8x32xf32, #tpu.memory_space<vmem>>, vector<8x32xf32>
    %c0_2 = arith.constant 0 : index
    %c0_3 = arith.constant 0 : index
    %4 = vector.load %arg5[%c0_2, %c0_3] : memref<32x128xf32, #tpu.memory_space<vmem>>, vector<32x128xf32>
    %cst = arith.constant dense<0.000000e+00> : vector<8x128xf32>
    %5 = tpu.matmul %3, %4, %cst {dimension_numbers = #tpu.dot_dimension_numbers<[1], [0], [0], [1], [0, 0, 1, 1], [], []>} : vector<8x32xf32>, vector<32x128xf32>, vector<8x128xf32> -> vector<8x128xf32>
    %c0_4 = arith.constant 0 : index
    %c0_5 = arith.constant 0 : index
    %6 = vector.load %arg6[%c0_4, %c0_5] : memref<1x128xf32, #tpu.memory_space<vmem>>, vector<1x128xf32>
    %7 = vector.broadcast %6 : vector<1x128xf32> to vector<8x128xf32>
    %8 = arith.addf %5, %7 : vector<8x128xf32>
    %c0_6 = arith.constant 0 : index
    %c0_7 = arith.constant 0 : index
    %9 = vector.load %arg7[%c0_6, %c0_7] : memref<8x128xf32, #tpu.memory_space<vmem>>, vector<8x128xf32>
    tpu.vector_store %arg7[%c0_6, %c0_7], %8 {strides = array<i32>} : memref<8x128xf32, #tpu.memory_space<vmem>>, vector<8x128xf32>,
    return
  }
  func.func @transform_0(%arg0: i32, %arg1: i32) -> (i32, i32) {
    %c0_i32 = arith.constant 0 : i32
    %c0_i32_0 = arith.constant 0 : i32
    return %arg0, %c0_i32 : i32, i32
  }
  func.func @transform_1(%arg0: i32, %arg1: i32) -> (i32, i32) {
    %c0_i32 = arith.constant 0 : i32
    %c0_i32_0 = arith.constant 0 : i32
    %c0_i32_1 = arith.constant 0 : i32
    return %c0_i32, %c0_i32_0 : i32, i32
  }
  func.func @transform_2(%arg0: i32, %arg1: i32) -> (i32, i32) {
    %c0_i32 = arith.constant 0 : i32
    %c0_i32_0 = arith.constant 0 : i32
    %c0_i32_1 = arith.constant 0 : i32
    return %c0_i32, %c0_i32_0 : i32, i32
  }
  func.func @transform_3(%arg0: i32, %arg1: i32) -> (i32, i32) {
    %c0_i32 = arith.constant 0 : i32
    %c0_i32_0 = arith.constant 0 : i32
    return %c0_i32, %arg1 : i32, i32
  }
  func.func @transform_4(%arg0: i32, %arg1: i32) -> (i32, i32) {
    %c0_i32 = arith.constant 0 : i32
    %c0_i32_0 = arith.constant 0 : i32
    return %c0_i32, %arg1 : i32, i32
  }
  func.func @transform_5(%arg0: i32, %arg1: i32) -> (i32, i32) {
    %c0_i32 = arith.constant 0 : i32
    return %arg0, %arg1 : i32, i32
  }
}

</mosaic_0001>

<bundles_post_ra>
// kernel: prenorm_linear.1
= control target key start
LH: loop header
LB: loop body
LE: loop exit
PB: predicated region body
PF: predicated region fallthrough
CT: control target
= control target key end

     0   :  { %s609_s18 = smov 0   ;;  %s611_s19 = smov 0   ;;  %s674_s0 = inlined_call_operand.vmem [shape: f32[16,32], index: 0, kind: input, shape index: {}]   ;;  %s675_s1 = inlined_call_operand.vmem [shape: f32[1,32], index: 1, kind: input, shape index: {}]   ;;  %s676_s2 = inlined_call_operand.vmem [shape: f32[1,32], index: 2, kind: input, shape index: {}]   ;;  %s677_s3 = inlined_call_operand.vmem [shape: f32[32,128], index: 3, kind: input, shape index: {}]   ;;  %s678_s4 = inlined_call_operand.vmem [shape: f32[1,128], index: 4, kind: input, shape index: {}]   ;;  %s679_s5 = inlined_call_operand.vmem [shape: f32[16,128], index: 5, kind: output, shape index: {}]  }
   0x1   :  { %s613_s20 = smov 0  }
   0x2 LB: > { %s27_s21 = sadd.s32 1, %s571_s19  ;;  %p500_p0 = scmp.ge.s32.totalorder %s575_s20, 1  ;;  %s575_s20 = sphi %s613_s20, %s15_s20   ;;  %s571_s19 = sphi %s611_s19, %s681_s19   ;;  %s567_s18 = sphi %s609_s18, %s680_s18  }
   0x3   : > { %p29_p1 = scmp.ge.s32.totalorder %s27_s21, 2  ;;  %p217_p2 = scmp.lt.s32.totalorder %s575_s20, 3 }
   0x5   : > { %s683_s21 = smov (%p29_p1, %s27_s21), 0  ;;  %p218_p3 = pnand %p500_p0, %p217_p2 }
   0x6   : > { %p253_p4 = scmp.lt.s32.totalorder (!%p218_p3), %s567_s18, 1 }
   0x7   : > { %221 = sbr.rel (%p218_p3) target bundleno = 528 (0x210), region = 40 }
   0xc   : > { %s685_s18 = smov (!%p253_p4, %s567_s18), 1  ;;  %vm276_vm0 = vcmask 261120   ;;  %v577_v7 = vmov 0.0   ;;  %v312_v8 = vld [vmem:[%s677_s3 + $0x18] sm:$0xff]  ;;  %v311_v9 = vld [vmem:[%s677_s3 + $0x10] sm:$0xff]  ;;  %vm578_vm1 = vmmov 0  }
   0xd   : > { %s501_s22 = sshll.u32 %s685_s18, 3  ;;  %514 = vmatprep.subr.mxu0 %v577_v7  ;;  %522 = vmatprep.mubr.msk.f32.mxu0 %vm578_vm1, %v577_v7  ;;  %v310_v10 = vld [vmem:[%s677_s3 + $0x8] sm:$0xff]  ;;  %v309_v11 = vld [vmem:[%s677_s3] sm:$0xff] }
   0xe   : > { %s256_s25 = scalar_lea.vmem %s674_s0, %s501_s22  ;;  %515 = vmatpush3.msra.mxu0 %v312_v8  ;;  %v503_v16 = vld [vmem:[%s675_s1] ss:$0 sm:$0xff]  ;;  %s270_s17 = scalar_lea.vmem %s679_s5, %s501_s22 }
   0xf   : > { %v275_v0 = vld [vmem:[%s256_s25] sm:$0xff]  ;;  %516 = vmatprep.subr.mxu0 %v577_v7 }
  0x10   : > { %v277_v1 = vsel %vm276_vm0, %v275_v0, 0.0  ;;  %517 = vmatpush3.msra.mxu0 %v311_v9  ;;  %v504_v18 = vld [vmem:[%s676_s2] ss:$0 sm:$0xff] }
  0x11   : > { %278 = vadd.xlane.f32.xlu0 %v277_v1  ;;  %518 = vmatprep.subr.mxu0 %v577_v7  ;;  %v505_v22 = vld [vmem:[%s678_s4] ss:$0 sm:$0xff] }
  0x12   : > { %519 = vmatpush3.msra.mxu0 %v310_v10 }
  0x13   : > { %520 = vmatprep.subr.mxu0 %v577_v7 }
  0x14   : > { %521 = vmatpush3.msra.mxu0 %v309_v11 }
  0x9a   : > { %v279_v2 = vpop.xlane.xlu0 %278 }
  0x9b   : > { %v281_v3 = vmul.f32 0.03125, %v279_v2 }
  0x9d   : > { %v282_v4 = vsub.f32 %v275_v0, %v281_v3 }
  0x9f   : > { %v283_v5 = vmul.f32 %v282_v4, %v282_v4 }
  0xa1   : > { %v284_v6 = vsel %vm276_vm0, %v283_v5, 0.0 }
  0xa2   : > { %285 = vadd.xlane.f32.xlu0 %v284_v6 }
 0x12b   : > { %v286_v12 = vpop.xlane.xlu0 %285 }
 0x12c   : > { %v287_v13 = vmul.f32 0.03125, %v286_v12 }
 0x12e   : > { %v288_v14 = vadd.f32 1e-05, %v287_v13 }
 0x130   : > { %551 = vrsqrt.f32 %v288_v14 }
 0x13d   : > { %v552_v15 = vpop.eup %551 }
 0x13e   : > { %v292_v17 = vmul.f32 %v552_v15, %v282_v4 }
 0x140   : > { %v299_v19 = vmul.f32 %v503_v16, %v292_v17 }
 0x142   : > { %v306_v20 = vadd.f32 %v504_v18, %v299_v19 }
 0x144   : > { %307 = vst.msk [vmem:[#allocation2] sm:$0xff] %vm276_vm0, %v306_v20 }
 0x14b   : > { %v308_v21 = vld [vmem:[#allocation2] sm:$0xff] }
 0x14c   : > { %523 = vmatmul.mubr.msk.f32.vlgmr.msra.gmra.mxu0 %vm276_vm0, %v308_v21 }
 0x20c   : > { %v390_v23 = vpop.f32.mrf.mxu0 }
 0x20d   : > { %v391_v24 = vadd.f32 %v505_v22, %v390_v23 }
 0x20e   : > { %v524_v25 = vpop.f32.mrf.mxu0 }
 0x20f   : > { %394 = vst [vmem:[%s270_s17] sm:$0xff] %v391_v24 }
 0x210 PF: > { %s15_s20 = sadd.s32 1, %s575_s20   ;;  %s680_s18 = smov %s571_s19 }
 0x211   : > { %p12_p5 = scmp.ge.s32.totalorder %s15_s20, 4   ;;  %s681_s19 = smov %s683_s21 }
 0x213   :  { %14 = sbr.rel (!%p12_p5) target bundleno = 2 (0x2), region = 80 }

</bundles_post_ra>
